<compile_context>
chip_gen: v6e
topology: v6e:2x2x1
jax: 0.10.0
libtpu: 0.0.40
codegen_flags: <defaults>
</compile_context>

<pallas_src>
import jax
import jax.numpy as jnp
from jax.experimental import pallas as pl
from jax.experimental.pallas import tpu as pltpu


# ----------------------------------------------------------------------------
# Fused kernel: LSTM recurrence + VAE head, one invocation, no grid.
# ----------------------------------------------------------------------------
def _make_fused_kernel(B, S, D_in, H, hidden, latent, out_w):
    N = B * S

    def kernel(x_ref, eps_ref, lstm_ref, fcw_ref, fcb_ref, out_ref, hseq_ref):
        f32 = jnp.float32

        # ---- static views into the packed LSTM slab ------------------------
        wih = lstm_ref[0:D_in, :]                       # (D_in, 4H)
        b_l = lstm_ref[D_in:D_in + 1, :]                # (1, 4H)  = b_ih + b_hh
        whh = lstm_ref[D_in + 1:D_in + 1 + H, :]        # (H, 4H)

        # ---- hoisted input-to-hidden matmul for ALL timesteps (one MXU op) -
        # rows are time-major (t, b)
        xg = jnp.dot(x_ref[...], wih, preferred_element_type=f32) + b_l  # (N, 4H)

        h = jnp.zeros((B, H), f32)
        c = jnp.zeros((B, H), f32)
        # S is static -> fully unrolled recurrence.  One merged matmul per
        # step on the serial chain; gate column order is i|f|g|o (torch LSTM).
        for t in range(S):
            g_all = (xg[t * B:(t + 1) * B, :]
                     + jnp.dot(h, whh, preferred_element_type=f32))      # (B, 4H)
            # 2 EUP pushes/step instead of 4: nonlinearities over the whole
            # lane-packed gate vreg, gates extracted with static lane slices.
            sig = jax.nn.sigmoid(g_all)
            tnh = jnp.tanh(g_all)
            i_g = sig[:, 0 * H:1 * H]
            f_g = sig[:, 1 * H:2 * H]
            g_g = tnh[:, 2 * H:3 * H]
            o_g = sig[:, 3 * H:4 * H]
            c = f_g * c + i_g * g_g
            h = o_g * jnp.tanh(c)
            # Direct VMEM scratch write -- no hs list / concatenate / reshape.
            hseq_ref[t * B:(t + 1) * B, :] = h

        h_flat = hseq_ref[...]                                            # (N, H)

        # ---- static views into packed FC weight slab + packed bias row -----
        r0 = 0
        w1 = fcw_ref[r0:r0 + H, 0:hidden];            r0 += H
        w2 = fcw_ref[r0:r0 + hidden, 0:2 * latent];   r0 += hidden   # [w21 | w22]
        w3 = fcw_ref[r0:r0 + latent, 0:hidden];       r0 += latent
        w4 = fcw_ref[r0:r0 + hidden, 0:D_in]

        fcb = fcb_ref[...]                                            # (1, >=128)
        c0 = 0
        b1 = fcb[:, c0:c0 + hidden];      c0 += hidden
        b2 = fcb[:, c0:c0 + 2 * latent];  c0 += 2 * latent            # [b21 | b22]
        b3 = fcb[:, c0:c0 + hidden];      c0 += hidden
        b4 = fcb[:, c0:c0 + D_in]

        # ---- VAE head: encode -> reparameterize -> KL -> decode ------------
        h1 = jnp.maximum(
            jnp.dot(h_flat, w1, preferred_element_type=f32) + b1, 0.0)    # (N, hidden)
        ml = jnp.dot(h1, w2, preferred_element_type=f32) + b2             # (N, 2*latent)
        mu = ml[:, 0:latent]
        logvar = ml[:, latent:2 * latent]

        std = jnp.exp(0.5 * logvar)
        z = mu + eps_ref[...] * std                                        # (N, latent)
        var = std * std                       # == exp(logvar), saves an EUP pass
        kl = jnp.sum(0.5 * (var + mu * mu - logvar - 1.0),
                     axis=-1, keepdims=True)                               # (N, 1)

        h3 = jnp.maximum(
            jnp.dot(z, w3, preferred_element_type=f32) + b3, 0.0)          # (N, hidden)
        dec = jnp.dot(h3, w4, preferred_element_type=f32) + b4             # (N, D_in)

        # ---- output slab: zero-fill once, then direct sub-slice stores -----
        out_ref[...] = jnp.zeros((N, out_w), f32)
        out_ref[:, 0:latent] = z
        out_ref[:, latent:latent + D_in] = dec
        out_ref[:, latent + D_in:latent + D_in + 1] = kl

    return kernel


# ----------------------------------------------------------------------------
# Parameter construction (deterministic, synthetic — mirrors __init__ shapes)
# ----------------------------------------------------------------------------
def init_params(key, input_size, latent_size, hidden_size, rnn_hidden_size):
    keys = jax.random.split(key, 16)
    s = 0.1

    def rnd(k, shp):
        return (s * jax.random.normal(k, shp)).astype(jnp.float32)

    H4 = 4 * rnn_hidden_size
    return {
        # path_encoder LSTM, stored transposed: (in, 4H) / (H, 4H),
        # gate column order i|f|g|o (matches torch.nn.LSTM).
        "w_ih_t": rnd(keys[0], (input_size, H4)),
        "w_hh_t": rnd(keys[1], (rnn_hidden_size, H4)),
        # combined bias: b_ih + b_hh
        "b_lstm": rnd(keys[2], (H4,)) + rnd(keys[3], (H4,)),
        # fc layers, stored transposed: (in, out)
        "w1_t": rnd(keys[4], (rnn_hidden_size, hidden_size)),
        "b1": rnd(keys[5], (hidden_size,)),
        "w21_t": rnd(keys[6], (hidden_size, latent_size)),
        "b21": rnd(keys[7], (latent_size,)),
        "w22_t": rnd(keys[8], (hidden_size, latent_size)),
        "b22": rnd(keys[9], (latent_size,)),
        "w3_t": rnd(keys[10], (latent_size, hidden_size)),
        "b3": rnd(keys[11], (hidden_size,)),
        "w4_t": rnd(keys[12], (hidden_size, input_size)),
        "b4": rnd(keys[13], (input_size,)),
    }


# ----------------------------------------------------------------------------
# Full forward (matches SequentialVAE.forward)
# ----------------------------------------------------------------------------
@jax.jit
def sequential_vae_forward(x, eps, params):
    """x: (B, S, D_in) float32.  eps: (B*S, latent) ~ N(0,1), (b, t) row order.

    Returns:
      z:       (B*S, latent)   rows in (b, t) order, matching PyTorch
      decoded: (B, S, D_in)
      kl:      (B, S)
    """
    B, S, D_in = x.shape
    N = B * S
    H = params["w_hh_t"].shape[0]
    hidden = params["w1_t"].shape[1]
    latent = params["w21_t"].shape[1]
    H4 = 4 * H
    out_w = max(128, -(-(latent + D_in + 1) // 128) * 128)

    # Time-major (t, b) row order inside the kernel: per-step gate reads are
    # contiguous blocks and the final re-layout disappears.  These permutes
    # touch only a few KB and are negligible XLA ops.
    x_tm = jnp.transpose(x, (1, 0, 2)).reshape(N, D_in)
    eps_tm = jnp.transpose(eps.reshape(B, S, latent), (1, 0, 2)).reshape(N, latent)

    # Packed LSTM slab: [W_ih^T ; b_ih+b_hh ; W_hh^T]  -> one DMA.
    lstm_slab = jnp.concatenate(
        [params["w_ih_t"],
         params["b_lstm"].reshape(1, H4),
         params["w_hh_t"]], axis=0)                        # (D_in + 1 + H, 4H)

    # Packed FC weight slab (columns padded to a common width) -> one DMA.
    # fc21|fc22 are fused column-wise so mu/logvar come from one matmul.
    fcw_cols = max(hidden, 2 * latent, D_in)

    def padc(w):
        return jnp.pad(w, ((0, 0), (0, fcw_cols - w.shape[1])))

    w2 = jnp.concatenate([params["w21_t"], params["w22_t"]], axis=1)
    fcw_slab = jnp.concatenate(
        [padc(params["w1_t"]), padc(w2), padc(params["w3_t"]), padc(params["w4_t"])],
        axis=0)                                            # (H+hidden+latent+hidden, fcw_cols)

    # All small biases packed into one (1, 128) lane row -> one DMA.
    fcb_len = 2 * hidden + 2 * latent + D_in
    fcb_w = max(128, -(-fcb_len // 128) * 128)
    fcb_row = jnp.concatenate(
        [params["b1"], params["b21"], params["b22"], params["b3"], params["b4"],
         jnp.zeros((fcb_w - fcb_len,), jnp.float32)]).reshape(1, fcb_w)

    inputs = [x_tm, eps_tm, lstm_slab, fcw_slab, fcb_row]

    def full(a):
        nd = a.ndim
        return pl.BlockSpec(a.shape, lambda: (0,) * nd)

    kernel = _make_fused_kernel(B, S, D_in, H, hidden, latent, out_w)

    slab = pl.pallas_call(
        kernel,
        out_shape=jax.ShapeDtypeStruct((N, out_w), jnp.float32),
        in_specs=[full(a) for a in inputs],
        out_specs=pl.BlockSpec((N, out_w), lambda: (0, 0)),
        scratch_shapes=[pltpu.VMEM((N, H), jnp.float32)],
    )(*inputs)

    # Un-permute from (t, b) back to the PyTorch (b, t) row order.
    slab_bt = jnp.transpose(slab.reshape(S, B, out_w), (1, 0, 2))   # (B, S, out_w)
    z = slab_bt.reshape(N, out_w)[:, :latent]
    decoded = slab_bt[:, :, latent:latent + D_in]
    kl = slab_bt[:, :, latent + D_in]
    return z, decoded, kl


if __name__ == "__main__":
    # Small shapes consistent with the module's forward signature.
    B, S = 2, 8
    INPUT_SIZE = 6
    LATENT_SIZE = 8
    HIDDEN_SIZE = 32
    RNN_HIDDEN_SIZE = 32

    key = jax.random.PRNGKey(0)
    k_x, k_eps, k_p = jax.random.split(key, 3)

    x = jax.random.normal(k_x, (B, S, INPUT_SIZE), dtype=jnp.float32)
    eps = jax.random.normal(k_eps, (B * S, LATENT_SIZE), dtype=jnp.float32)
    params = init_params(k_p, INPUT_SIZE, LATENT_SIZE, HIDDEN_SIZE,
                         RNN_HIDDEN_SIZE)

    z, decoded, kl = sequential_vae_forward(x, eps, params)
    jax.block_until_ready((z, decoded, kl))

    assert z.shape == (B * S, LATENT_SIZE)
    assert decoded.shape == (B, S, INPUT_SIZE)
    assert kl.shape == (B, S)
    assert bool(jnp.all(jnp.isfinite(z)))
    assert bool(jnp.all(jnp.isfinite(decoded)))
    assert bool(jnp.all(jnp.isfinite(kl)))

    print("KERNEL_OK")
</pallas_src>

<mosaic_0001>
module attributes {stable_mosaic.version = 11 : i64} {
  func.func @kernel(%arg0: memref<16x6xf32, #tpu.memory_space<vmem>>, %arg1: memref<16x8xf32, #tpu.memory_space<vmem>>, %arg2: memref<39x128xf32, #tpu.memory_space<vmem>>, %arg3: memref<104x32xf32, #tpu.memory_space<vmem>>, %arg4: memref<1x128xf32, #tpu.memory_space<vmem>>, %arg5: memref<16x128xf32, #tpu.memory_space<vmem>>, %arg6: memref<16x32xf32, #tpu.memory_space<vmem>>) attributes {dimension_semantics = [], scalar_prefetch = 0 : i64, scratch_operands = 1 : i64, tpu.core_type = #tpu.core_type<tc>} {
    %c0 = arith.constant 0 : index
    %c0_0 = arith.constant 0 : index
    %0 = vector.load %arg2[%c0, %c0_0] : memref<39x128xf32, #tpu.memory_space<vmem>>, vector<6x128xf32>
    %c6 = arith.constant 6 : index
    %c0_1 = arith.constant 0 : index
    %1 = vector.load %arg2[%c6, %c0_1] : memref<39x128xf32, #tpu.memory_space<vmem>>, vector<1x128xf32>
    %c7 = arith.constant 7 : index
    %c0_2 = arith.constant 0 : index
    %2 = vector.load %arg2[%c7, %c0_2] : memref<39x128xf32, #tpu.memory_space<vmem>>, vector<32x128xf32>
    %c0_3 = arith.constant 0 : index
    %c0_4 = arith.constant 0 : index
    %3 = vector.load %arg0[%c0_3, %c0_4] : memref<16x6xf32, #tpu.memory_space<vmem>>, vector<16x6xf32>
    %cst = arith.constant dense<0.000000e+00> : vector<16x128xf32>
    %4 = tpu.matmul %3, %0, %cst {dimension_numbers = #tpu.dot_dimension_numbers<[1], [0], [0], [1], [0, 0, 1, 1], [], []>} : vector<16x6xf32>, vector<6x128xf32>, vector<16x128xf32> -> vector<16x128xf32>
    %5 = vector.broadcast %1 : vector<1x128xf32> to vector<16x128xf32>
    %6 = arith.addf %4, %5 : vector<16x128xf32>
    %cst_5 = arith.constant 0.000000e+00 : f32
    %7 = vector.broadcast %cst_5 : f32 to vector<2x32xf32>
    %cst_6 = arith.constant 0.000000e+00 : f32
    %8 = vector.broadcast %cst_6 : f32 to vector<2x32xf32>
    %9 = vector.extract_strided_slice %6 {offsets = [0, 0], sizes = [2, 128], strides = [1, 1]} : vector<16x128xf32> to vector<2x128xf32>
    %cst_7 = arith.constant dense<0.000000e+00> : vector<2x128xf32>
    %10 = tpu.matmul %7, %2, %cst_7 {dimension_numbers = #tpu.dot_dimension_numbers<[1], [0], [0], [1], [0, 0, 1, 1], [], []>} : vector<2x32xf32>, vector<32x128xf32>, vector<2x128xf32> -> vector<2x128xf32>
    %11 = arith.addf %9, %10 : vector<2x128xf32>
    %12 = arith.negf %11 : vector<2x128xf32>
    %13 = math.exp %12 : vector<2x128xf32>
    %cst_8 = arith.constant 1.000000e+00 : f32
    %14 = vector.broadcast %cst_8 : f32 to vector<2x128xf32>
    %15 = arith.addf %14, %13 : vector<2x128xf32>
    %16 = arith.divf %14, %15 : vector<2x128xf32>
    %17 = math.tanh %11 : vector<2x128xf32>
    %18 = vector.extract_strided_slice %16 {offsets = [0, 0], sizes = [2, 32], strides = [1, 1]} : vector<2x128xf32> to vector<2x32xf32>
    %19 = vector.extract_strided_slice %16 {offsets = [0, 32], sizes = [2, 32], strides = [1, 1]} : vector<2x128xf32> to vector<2x32xf32>
    %20 = vector.extract_strided_slice %17 {offsets = [0, 64], sizes = [2, 32], strides = [1, 1]} : vector<2x128xf32> to vector<2x32xf32>
    %21 = vector.extract_strided_slice %16 {offsets = [0, 96], sizes = [2, 32], strides = [1, 1]} : vector<2x128xf32> to vector<2x32xf32>
    %22 = arith.mulf %19, %8 : vector<2x32xf32>
    %23 = arith.mulf %18, %20 : vector<2x32xf32>
    %24 = arith.addf %22, %23 : vector<2x32xf32>
    %25 = math.tanh %24 : vector<2x32xf32>
    %26 = arith.mulf %21, %25 : vector<2x32xf32>
    %c0_9 = arith.constant 0 : index
    %c0_10 = arith.constant 0 : index
    %27 = vector.load %arg6[%c0_9, %c0_10] : memref<16x32xf32, #tpu.memory_space<vmem>>, vector<2x32xf32>
    tpu.vector_store %arg6[%c0_9, %c0_10], %26 {strides = array<i32>} : memref<16x32xf32, #tpu.memory_space<vmem>>, vector<2x32xf32>,
    %28 = vector.extract_strided_slice %6 {offsets = [2, 0], sizes = [2, 128], strides = [1, 1]} : vector<16x128xf32> to vector<2x128xf32>
    %cst_11 = arith.constant dense<0.000000e+00> : vector<2x128xf32>
    %29 = tpu.matmul %26, %2, %cst_11 {dimension_numbers = #tpu.dot_dimension_numbers<[1], [0], [0], [1], [0, 0, 1, 1], [], []>} : vector<2x32xf32>, vector<32x128xf32>, vector<2x128xf32> -> vector<2x128xf32>
    %30 = arith.addf %28, %29 : vector<2x128xf32>
    %31 = arith.negf %30 : vector<2x128xf32>
    %32 = math.exp %31 : vector<2x128xf32>
    %cst_12 = arith.constant 1.000000e+00 : f32
    %33 = vector.broadcast %cst_12 : f32 to vector<2x128xf32>
    %34 = arith.addf %33, %32 : vector<2x128xf32>
    %35 = arith.divf %33, %34 : vector<2x128xf32>
    %36 = math.tanh %30 : vector<2x128xf32>
    %37 = vector.extract_strided_slice %35 {offsets = [0, 0], sizes = [2, 32], strides = [1, 1]} : vector<2x128xf32> to vector<2x32xf32>
    %38 = vector.extract_strided_slice %35 {offsets = [0, 32], sizes = [2, 32], strides = [1, 1]} : vector<2x128xf32> to vector<2x32xf32>
    %39 = vector.extract_strided_slice %36 {offsets = [0, 64], sizes = [2, 32], strides = [1, 1]} : vector<2x128xf32> to vector<2x32xf32>
    %40 = vector.extract_strided_slice %35 {offsets = [0, 96], sizes = [2, 32], strides = [1, 1]} : vector<2x128xf32> to vector<2x32xf32>
    %41 = arith.mulf %38, %24 : vector<2x32xf32>
    %42 = arith.mulf %37, %39 : vector<2x32xf32>
    %43 = arith.addf %41, %42 : vector<2x32xf32>
    %44 = math.tanh %43 : vector<2x32xf32>
    %45 = arith.mulf %40, %44 : vector<2x32xf32>
    %c2 = arith.constant 2 : index
    %c0_13 = arith.constant 0 : index
    %46 = vector.load %arg6[%c2, %c0_13] : memref<16x32xf32, #tpu.memory_space<vmem>>, vector<2x32xf32>
    tpu.vector_store %arg6[%c2, %c0_13], %45 {strides = array<i32>} : memref<16x32xf32, #tpu.memory_space<vmem>>, vector<2x32xf32>,
    %47 = vector.extract_strided_slice %6 {offsets = [4, 0], sizes = [2, 128], strides = [1, 1]} : vector<16x128xf32> to vector<2x128xf32>
    %cst_14 = arith.constant dense<0.000000e+00> : vector<2x128xf32>
    %48 = tpu.matmul %45, %2, %cst_14 {dimension_numbers = #tpu.dot_dimension_numbers<[1], [0], [0], [1], [0, 0, 1, 1], [], []>} : vector<2x32xf32>, vector<32x128xf32>, vector<2x128xf32> -> vector<2x128xf32>
    %49 = arith.addf %47, %48 : vector<2x128xf32>
    %50 = arith.negf %49 : vector<2x128xf32>
    %51 = math.exp %50 : vector<2x128xf32>
    %cst_15 = arith.constant 1.000000e+00 : f32
    %52 = vector.broadcast %cst_15 : f32 to vector<2x128xf32>
    %53 = arith.addf %52, %51 : vector<2x128xf32>
    %54 = arith.divf %52, %53 : vector<2x128xf32>
    %55 = math.tanh %49 : vector<2x128xf32>
    %56 = vector.extract_strided_slice %54 {offsets = [0, 0], sizes = [2, 32], strides = [1, 1]} : vector<2x128xf32> to vector<2x32xf32>
    %57 = vector.extract_strided_slice %54 {offsets = [0, 32], sizes = [2, 32], strides = [1, 1]} : vector<2x128xf32> to vector<2x32xf32>
    %58 = vector.extract_strided_slice %55 {offsets = [0, 64], sizes = [2, 32], strides = [1, 1]} : vector<2x128xf32> to vector<2x32xf32>
    %59 = vector.extract_strided_slice %54 {offsets = [0, 96], sizes = [2, 32], strides = [1, 1]} : vector<2x128xf32> to vector<2x32xf32>
    %60 = arith.mulf %57, %43 : vector<2x32xf32>
    %61 = arith.mulf %56, %58 : vector<2x32xf32>
    %62 = arith.addf %60, %61 : vector<2x32xf32>
    %63 = math.tanh %62 : vector<2x32xf32>
    %64 = arith.mulf %59, %63 : vector<2x32xf32>
    %c4 = arith.constant 4 : index
    %c0_16 = arith.constant 0 : index
    %65 = vector.load %arg6[%c4, %c0_16] : memref<16x32xf32, #tpu.memory_space<vmem>>, vector<2x32xf32>
    tpu.vector_store %arg6[%c4, %c0_16], %64 {strides = array<i32>} : memref<16x32xf32, #tpu.memory_space<vmem>>, vector<2x32xf32>,
    %66 = vector.extract_strided_slice %6 {offsets = [6, 0], sizes = [2, 128], strides = [1, 1]} : vector<16x128xf32> to vector<2x128xf32>
    %cst_17 = arith.constant dense<0.000000e+00> : vector<2x128xf32>
    %67 = tpu.matmul %64, %2, %cst_17 {dimension_numbers = #tpu.dot_dimension_numbers<[1], [0], [0], [1], [0, 0, 1, 1], [], []>} : vector<2x32xf32>, vector<32x128xf32>, vector<2x128xf32> -> vector<2x128xf32>
    %68 = arith.addf %66, %67 : vector<2x128xf32>
    %69 = arith.negf %68 : vector<2x128xf32>
    %70 = math.exp %69 : vector<2x128xf32>
    %cst_18 = arith.constant 1.000000e+00 : f32
    %71 = vector.broadcast %cst_18 : f32 to vector<2x128xf32>
    %72 = arith.addf %71, %70 : vector<2x128xf32>
    %73 = arith.divf %71, %72 : vector<2x128xf32>
    %74 = math.tanh %68 : vector<2x128xf32>
    %75 = vector.extract_strided_slice %73 {offsets = [0, 0], sizes = [2, 32], strides = [1, 1]} : vector<2x128xf32> to vector<2x32xf32>
    %76 = vector.extract_strided_slice %73 {offsets = [0, 32], sizes = [2, 32], strides = [1, 1]} : vector<2x128xf32> to vector<2x32xf32>
    %77 = vector.extract_strided_slice %74 {offsets = [0, 64], sizes = [2, 32], strides = [1, 1]} : vector<2x128xf32> to vector<2x32xf32>
    %78 = vector.extract_strided_slice %73 {offsets = [0, 96], sizes = [2, 32], strides = [1, 1]} : vector<2x128xf32> to vector<2x32xf32>
    %79 = arith.mulf %76, %62 : vector<2x32xf32>
    %80 = arith.mulf %75, %77 : vector<2x32xf32>
    %81 = arith.addf %79, %80 : vector<2x32xf32>
    %82 = math.tanh %81 : vector<2x32xf32>
    %83 = arith.mulf %78, %82 : vector<2x32xf32>
    %c6_19 = arith.constant 6 : index
    %c0_20 = arith.constant 0 : index
    %84 = vector.load %arg6[%c6_19, %c0_20] : memref<16x32xf32, #tpu.memory_space<vmem>>, vector<2x32xf32>
    tpu.vector_store %arg6[%c6_19, %c0_20], %83 {strides = array<i32>} : memref<16x32xf32, #tpu.memory_space<vmem>>, vector<2x32xf32>,
    %85 = vector.extract_strided_slice %6 {offsets = [8, 0], sizes = [2, 128], strides = [1, 1]} : vector<16x128xf32> to vector<2x128xf32>
    %cst_21 = arith.constant dense<0.000000e+00> : vector<2x128xf32>
    %86 = tpu.matmul %83, %2, %cst_21 {dimension_numbers = #tpu.dot_dimension_numbers<[1], [0], [0], [1], [0, 0, 1, 1], [], []>} : vector<2x32xf32>, vector<32x128xf32>, vector<2x128xf32> -> vector<2x128xf32>
    %87 = arith.addf %85, %86 : vector<2x128xf32>
    %88 = arith.negf %87 : vector<2x128xf32>
    %89 = math.exp %88 : vector<2x128xf32>
    %cst_22 = arith.constant 1.000000e+00 : f32
    %90 = vector.broadcast %cst_22 : f32 to vector<2x128xf32>
    %91 = arith.addf %90, %89 : vector<2x128xf32>
    %92 = arith.divf %90, %91 : vector<2x128xf32>
    %93 = math.tanh %87 : vector<2x128xf32>
    %94 = vector.extract_strided_slice %92 {offsets = [0, 0], sizes = [2, 32], strides = [1, 1]} : vector<2x128xf32> to vector<2x32xf32>
    %95 = vector.extract_strided_slice %92 {offsets = [0, 32], sizes = [2, 32], strides = [1, 1]} : vector<2x128xf32> to vector<2x32xf32>
    %96 = vector.extract_strided_slice %93 {offsets = [0, 64], sizes = [2, 32], strides = [1, 1]} : vector<2x128xf32> to vector<2x32xf32>
    %97 = vector.extract_strided_slice %92 {offsets = [0, 96], sizes = [2, 32], strides = [1, 1]} : vector<2x128xf32> to vector<2x32xf32>
    %98 = arith.mulf %95, %81 : vector<2x32xf32>
    %99 = arith.mulf %94, %96 : vector<2x32xf32>
    %100 = arith.addf %98, %99 : vector<2x32xf32>
    %101 = math.tanh %100 : vector<2x32xf32>
    %102 = arith.mulf %97, %101 : vector<2x32xf32>
    %c8 = arith.constant 8 : index
    %c0_23 = arith.constant 0 : index
    %103 = vector.load %arg6[%c8, %c0_23] : memref<16x32xf32, #tpu.memory_space<vmem>>, vector<2x32xf32>
    tpu.vector_store %arg6[%c8, %c0_23], %102 {strides = array<i32>} : memref<16x32xf32, #tpu.memory_space<vmem>>, vector<2x32xf32>,
    %104 = vector.extract_strided_slice %6 {offsets = [10, 0], sizes = [2, 128], strides = [1, 1]} : vector<16x128xf32> to vector<2x128xf32>
    %cst_24 = arith.constant dense<0.000000e+00> : vector<2x128xf32>
    %105 = tpu.matmul %102, %2, %cst_24 {dimension_numbers = #tpu.dot_dimension_numbers<[1], [0], [0], [1], [0, 0, 1, 1], [], []>} : vector<2x32xf32>, vector<32x128xf32>, vector<2x128xf32> -> vector<2x128xf32>
    %106 = arith.addf %104, %105 : vector<2x128xf32>
    %107 = arith.negf %106 : vector<2x128xf32>
    %108 = math.exp %107 : vector<2x128xf32>
    %cst_25 = arith.constant 1.000000e+00 : f32
    %109 = vector.broadcast %cst_25 : f32 to vector<2x128xf32>
    %110 = arith.addf %109, %108 : vector<2x128xf32>
    %111 = arith.divf %109, %110 : vector<2x128xf32>
    %112 = math.tanh %106 : vector<2x128xf32>
    %113 = vector.extract_strided_slice %111 {offsets = [0, 0], sizes = [2, 32], strides = [1, 1]} : vector<2x128xf32> to vector<2x32xf32>
    %114 = vector.extract_strided_slice %111 {offsets = [0, 32], sizes = [2, 32], strides = [1, 1]} : vector<2x128xf32> to vector<2x32xf32>
    %115 = vector.extract_strided_slice %112 {offsets = [0, 64], sizes = [2, 32], strides = [1, 1]} : vector<2x128xf32> to vector<2x32xf32>
    %116 = vector.extract_strided_slice %111 {offsets = [0, 96], sizes = [2, 32], strides = [1, 1]} : vector<2x128xf32> to vector<2x32xf32>
    %117 = arith.mulf %114, %100 : vector<2x32xf32>
    %118 = arith.mulf %113, %115 : vector<2x32xf32>
    %119 = arith.addf %117, %118 : vector<2x32xf32>
    %120 = math.tanh %119 : vector<2x32xf32>
    %121 = arith.mulf %116, %120 : vector<2x32xf32>
    %c10 = arith.constant 10 : index
    %c0_26 = arith.constant 0 : index
    %122 = vector.load %arg6[%c10, %c0_26] : memref<16x32xf32, #tpu.memory_space<vmem>>, vector<2x32xf32>
    tpu.vector_store %arg6[%c10, %c0_26], %121 {strides = array<i32>} : memref<16x32xf32, #tpu.memory_space<vmem>>, vector<2x32xf32>,
    %123 = vector.extract_strided_slice %6 {offsets = [12, 0], sizes = [2, 128], strides = [1, 1]} : vector<16x128xf32> to vector<2x128xf32>
    %cst_27 = arith.constant dense<0.000000e+00> : vector<2x128xf32>
    %124 = tpu.matmul %121, %2, %cst_27 {dimension_numbers = #tpu.dot_dimension_numbers<[1], [0], [0], [1], [0, 0, 1, 1], [], []>} : vector<2x32xf32>, vector<32x128xf32>, vector<2x128xf32> -> vector<2x128xf32>
    %125 = arith.addf %123, %124 : vector<2x128xf32>
    %126 = arith.negf %125 : vector<2x128xf32>
    %127 = math.exp %126 : vector<2x128xf32>
    %cst_28 = arith.constant 1.000000e+00 : f32
    %128 = vector.broadcast %cst_28 : f32 to vector<2x128xf32>
    %129 = arith.addf %128, %127 : vector<2x128xf32>
    %130 = arith.divf %128, %129 : vector<2x128xf32>
    %131 = math.tanh %125 : vector<2x128xf32>
    %132 = vector.extract_strided_slice %130 {offsets = [0, 0], sizes = [2, 32], strides = [1, 1]} : vector<2x128xf32> to vector<2x32xf32>
    %133 = vector.extract_strided_slice %130 {offsets = [0, 32], sizes = [2, 32], strides = [1, 1]} : vector<2x128xf32> to vector<2x32xf32>
    %134 = vector.extract_strided_slice %131 {offsets = [0, 64], sizes = [2, 32], strides = [1, 1]} : vector<2x128xf32> to vector<2x32xf32>
    %135 = vector.extract_strided_slice %130 {offsets = [0, 96], sizes = [2, 32], strides = [1, 1]} : vector<2x128xf32> to vector<2x32xf32>
    %136 = arith.mulf %133, %119 : vector<2x32xf32>
    %137 = arith.mulf %132, %134 : vector<2x32xf32>
    %138 = arith.addf %136, %137 : vector<2x32xf32>
    %139 = math.tanh %138 : vector<2x32xf32>
    %140 = arith.mulf %135, %139 : vector<2x32xf32>
    %c12 = arith.constant 12 : index
    %c0_29 = arith.constant 0 : index
    %141 = vector.load %arg6[%c12, %c0_29] : memref<16x32xf32, #tpu.memory_space<vmem>>, vector<2x32xf32>
    tpu.vector_store %arg6[%c12, %c0_29], %140 {strides = array<i32>} : memref<16x32xf32, #tpu.memory_space<vmem>>, vector<2x32xf32>,
    %142 = vector.extract_strided_slice %6 {offsets = [14, 0], sizes = [2, 128], strides = [1, 1]} : vector<16x128xf32> to vector<2x128xf32>
    %cst_30 = arith.constant dense<0.000000e+00> : vector<2x128xf32>
    %143 = tpu.matmul %140, %2, %cst_30 {dimension_numbers = #tpu.dot_dimension_numbers<[1], [0], [0], [1], [0, 0, 1, 1], [], []>} : vector<2x32xf32>, vector<32x128xf32>, vector<2x128xf32> -> vector<2x128xf32>
    %144 = arith.addf %142, %143 : vector<2x128xf32>
    %145 = arith.negf %144 : vector<2x128xf32>
    %146 = math.exp %145 : vector<2x128xf32>
    %cst_31 = arith.constant 1.000000e+00 : f32
    %147 = vector.broadcast %cst_31 : f32 to vector<2x128xf32>
    %148 = arith.addf %147, %146 : vector<2x128xf32>
    %149 = arith.divf %147, %148 : vector<2x128xf32>
    %150 = math.tanh %144 : vector<2x128xf32>
    %151 = vector.extract_strided_slice %149 {offsets = [0, 0], sizes = [2, 32], strides = [1, 1]} : vector<2x128xf32> to vector<2x32xf32>
    %152 = vector.extract_strided_slice %149 {offsets = [0, 32], sizes = [2, 32], strides = [1, 1]} : vector<2x128xf32> to vector<2x32xf32>
    %153 = vector.extract_strided_slice %150 {offsets = [0, 64], sizes = [2, 32], strides = [1, 1]} : vector<2x128xf32> to vector<2x32xf32>
    %154 = vector.extract_strided_slice %149 {offsets = [0, 96], sizes = [2, 32], strides = [1, 1]} : vector<2x128xf32> to vector<2x32xf32>
    %155 = arith.mulf %152, %138 : vector<2x32xf32>
    %156 = arith.mulf %151, %153 : vector<2x32xf32>
    %157 = arith.addf %155, %156 : vector<2x32xf32>
    %158 = math.tanh %157 : vector<2x32xf32>
    %159 = arith.mulf %154, %158 : vector<2x32xf32>
    %c14 = arith.constant 14 : index
    %c0_32 = arith.constant 0 : index
    %160 = vector.load %arg6[%c14, %c0_32] : memref<16x32xf32, #tpu.memory_space<vmem>>, vector<2x32xf32>
    tpu.vector_store %arg6[%c14, %c0_32], %159 {strides = array<i32>} : memref<16x32xf32, #tpu.memory_space<vmem>>, vector<2x32xf32>,
    %c0_33 = arith.constant 0 : index
    %c0_34 = arith.constant 0 : index
    %161 = vector.load %arg6[%c0_33, %c0_34] : memref<16x32xf32, #tpu.memory_space<vmem>>, vector<16x32xf32>
    %c0_35 = arith.constant 0 : index
    %c0_36 = arith.constant 0 : index
    %162 = vector.load %arg3[%c0_35, %c0_36] : memref<104x32xf32, #tpu.memory_space<vmem>>, vector<32x32xf32>
    %c32 = arith.constant 32 : index
    %c0_37 = arith.constant 0 : index
    %163 = vector.load %arg3[%c32, %c0_37] : memref<104x32xf32, #tpu.memory_space<vmem>>, vector<32x16xf32>
    %c64 = arith.constant 64 : index
    %c0_38 = arith.constant 0 : index
    %164 = vector.load %arg3[%c64, %c0_38] : memref<104x32xf32, #tpu.memory_space<vmem>>, vector<8x32xf32>
    %c72 = arith.constant 72 : index
    %c0_39 = arith.constant 0 : index
    %165 = vector.load %arg3[%c72, %c0_39] : memref<104x32xf32, #tpu.memory_space<vmem>>, vector<32x6xf32>
    %c0_40 = arith.constant 0 : index
    %c0_41 = arith.constant 0 : index
    %166 = vector.load %arg4[%c0_40, %c0_41] : memref<1x128xf32, #tpu.memory_space<vmem>>, vector<1x128xf32>
    %167 = vector.extract_strided_slice %166 {offsets = [0, 0], sizes = [1, 32], strides = [1, 1]} : vector<1x128xf32> to vector<1x32xf32>
    %168 = vector.extract_strided_slice %166 {offsets = [0, 32], sizes = [1, 16], strides = [1, 1]} : vector<1x128xf32> to vector<1x16xf32>
    %169 = vector.extract_strided_slice %166 {offsets = [0, 48], sizes = [1, 32], strides = [1, 1]} : vector<1x128xf32> to vector<1x32xf32>
    %170 = vector.extract_strided_slice %166 {offsets = [0, 80], sizes = [1, 6], strides = [1, 1]} : vector<1x128xf32> to vector<1x6xf32>
    %cst_42 = arith.constant dense<0.000000e+00> : vector<16x32xf32>
    %171 = tpu.matmul %161, %162, %cst_42 {dimension_numbers = #tpu.dot_dimension_numbers<[1], [0], [0], [1], [0, 0, 1, 1], [], []>} : vector<16x32xf32>, vector<32x32xf32>, vector<16x32xf32> -> vector<16x32xf32>
    %172 = vector.broadcast %167 : vector<1x32xf32> to vector<16x32xf32>
    %173 = arith.addf %171, %172 : vector<16x32xf32>
    %cst_43 = arith.constant 0.000000e+00 : f32
    %174 = vector.broadcast %cst_43 : f32 to vector<16x32xf32>
    %175 = arith.maximumf %173, %174 : vector<16x32xf32>
    %cst_44 = arith.constant dense<0.000000e+00> : vector<16x16xf32>
    %176 = tpu.matmul %175, %163, %cst_44 {dimension_numbers = #tpu.dot_dimension_numbers<[1], [0], [0], [1], [0, 0, 1, 1], [], []>} : vector<16x32xf32>, vector<32x16xf32>, vector<16x16xf32> -> vector<16x16xf32>
    %177 = vector.broadcast %168 : vector<1x16xf32> to vector<16x16xf32>
    %178 = arith.addf %176, %177 : vector<16x16xf32>
    %179 = vector.extract_strided_slice %178 {offsets = [0, 0], sizes = [16, 8], strides = [1, 1]} : vector<16x16xf32> to vector<16x8xf32>
    %180 = vector.extract_strided_slice %178 {offsets = [0, 8], sizes = [16, 8], strides = [1, 1]} : vector<16x16xf32> to vector<16x8xf32>
    %cst_45 = arith.constant 5.000000e-01 : f32
    %181 = vector.broadcast %cst_45 : f32 to vector<16x8xf32>
    %182 = arith.mulf %181, %180 : vector<16x8xf32>
    %183 = math.exp %182 : vector<16x8xf32>
    %c0_46 = arith.constant 0 : index
    %c0_47 = arith.constant 0 : index
    %184 = vector.load %arg1[%c0_46, %c0_47] : memref<16x8xf32, #tpu.memory_space<vmem>>, vector<16x8xf32>
    %185 = arith.mulf %184, %183 : vector<16x8xf32>
    %186 = arith.addf %179, %185 : vector<16x8xf32>
    %187 = arith.mulf %183, %183 : vector<16x8xf32>
    %188 = arith.mulf %179, %179 : vector<16x8xf32>
    %189 = arith.addf %187, %188 : vector<16x8xf32>
    %190 = arith.subf %189, %180 : vector<16x8xf32>
    %cst_48 = arith.constant 1.000000e+00 : f32
    %191 = vector.broadcast %cst_48 : f32 to vector<16x8xf32>
    %192 = arith.subf %190, %191 : vector<16x8xf32>
    %cst_49 = arith.constant 5.000000e-01 : f32
    %193 = vector.broadcast %cst_49 : f32 to vector<16x8xf32>
    %194 = arith.mulf %193, %192 : vector<16x8xf32>
    %cst_50 = arith.constant dense<0.000000e+00> : vector<16xf32>
    %195 = vector.multi_reduction <add>, %194, %cst_50 [1] : vector<16x8xf32> to vector<16xf32>
    %196 = vector.shape_cast %195 : vector<16xf32> to vector<16x1xf32>
    %cst_51 = arith.constant dense<0.000000e+00> : vector<16x32xf32>
    %197 = tpu.matmul %186, %164, %cst_51 {dimension_numbers = #tpu.dot_dimension_numbers<[1], [0], [0], [1], [0, 0, 1, 1], [], []>} : vector<16x8xf32>, vector<8x32xf32>, vector<16x32xf32> -> vector<16x32xf32>
    %198 = vector.broadcast %169 : vector<1x32xf32> to vector<16x32xf32>
    %199 = arith.addf %197, %198 : vector<16x32xf32>
    %cst_52 = arith.constant 0.000000e+00 : f32
    %200 = vector.broadcast %cst_52 : f32 to vector<16x32xf32>
    %201 = arith.maximumf %199, %200 : vector<16x32xf32>
    %cst_53 = arith.constant dense<0.000000e+00> : vector<16x6xf32>
    %202 = tpu.matmul %201, %165, %cst_53 {dimension_numbers = #tpu.dot_dimension_numbers<[1], [0], [0], [1], [0, 0, 1, 1], [], []>} : vector<16x32xf32>, vector<32x6xf32>, vector<16x6xf32> -> vector<16x6xf32>
    %203 = vector.broadcast %170 : vector<1x6xf32> to vector<16x6xf32>
    %204 = arith.addf %202, %203 : vector<16x6xf32>
    %cst_54 = arith.constant 0.000000e+00 : f32
    %205 = vector.broadcast %cst_54 : f32 to vector<16x128xf32>
    %c0_55 = arith.constant 0 : index
    %c0_56 = arith.constant 0 : index
    %206 = vector.load %arg5[%c0_55, %c0_56] : memref<16x128xf32, #tpu.memory_space<vmem>>, vector<16x128xf32>
    tpu.vector_store %arg5[%c0_55, %c0_56], %205 {strides = array<i32>} : memref<16x128xf32, #tpu.memory_space<vmem>>, vector<16x128xf32>,
    %c0_57 = arith.constant 0 : index
    %c0_58 = arith.constant 0 : index
    %207 = vector.load %arg5[%c0_57, %c0_58] : memref<16x128xf32, #tpu.memory_space<vmem>>, vector<16x8xf32>
    tpu.vector_store %arg5[%c0_57, %c0_58], %186 {strides = array<i32>} : memref<16x128xf32, #tpu.memory_space<vmem>>, vector<16x8xf32>,
    %c0_59 = arith.constant 0 : index
    %c8_60 = arith.constant 8 : index
    %208 = vector.load %arg5[%c0_59, %c8_60] : memref<16x128xf32, #tpu.memory_space<vmem>>, vector<16x6xf32>
    tpu.vector_store %arg5[%c0_59, %c8_60], %204 {strides = array<i32>} : memref<16x128xf32, #tpu.memory_space<vmem>>, vector<16x6xf32>,
    %c0_61 = arith.constant 0 : index
    %c14_62 = arith.constant 14 : index
    %209 = vector.load %arg5[%c0_61, %c14_62] : memref<16x128xf32, #tpu.memory_space<vmem>>, vector<16x1xf32>
    tpu.vector_store %arg5[%c0_61, %c14_62], %196 {strides = array<i32>} : memref<16x128xf32, #tpu.memory_space<vmem>>, vector<16x1xf32>,
    return
  }
}

</mosaic_0001>

<bundles_post_ra>
// kernel: sequential_vae_forward.1
= control target key start
LH: loop header
LB: loop body
LE: loop exit
PB: predicated region body
PF: predicated region fallthrough
CT: control target
= control target key end

     0   :  { %vm39_vm0 = vcmask 1045504   ;;  %vm32_vm1 = vcmask 48128   ;;  %v1732_v3 = vmov 0.0   ;;  %vm1733_vm2 = vmmov 0   ;;  %s1734_s8 = smov 64   ;;  %s1736_s26 = smov 96   ;;  %s2065_s2 = inlined_call_operand.vmem [shape: f32[39,128], index: 2, kind: input, shape index: {}]   ;;  %s2066_s0 = inlined_call_operand.vmem [shape: f32[16,6], index: 0, kind: input, shape index: {}]   ;;  %s2067_s3 = inlined_call_operand.vmem [shape: f32[104,32], index: 3, kind: input, shape index: {}]   ;;  %s2068_s4 = inlined_call_operand.vmem [shape: f32[1,128], index: 4, kind: input, shape index: {}]   ;;  %s2069_s5 = inlined_call_operand.vmem [shape: f32[16,128], index: 5, kind: output, shape index: {}]   ;;  %s2070_s1 = inlined_call_operand.vmem [shape: f32[16,8], index: 1, kind: input, shape index: {}]  }
   0x1   :  { %v20_v0 = vld [vmem:[%s2065_s2] sm:$0x3f]  ;;  %v27_v2 = vld [vmem:[%s2066_s0 + $0x8] sm:$0xff]  ;;  %1540 = vmatprep.subr.mxu0 %v1732_v3  ;;  %1548 = vmatprep.mubr.msk.f32.mxu0 %vm1733_vm2, %v1732_v3  ;;  %v1793_v5 = vld [vmem:[%s2065_s2 + $0x17] sm:$0xff]  ;;  %vm221_vm3 = vcmask 254976   ;;  %vm118_vm4 = vcmask 261120   ;;  %1408 = vst [vmem:[%s2069_s5] sm:$0xff] %v1732_v3 }
   0x2   :  { %v26_v1 = vld [vmem:[%s2066_s0] sm:$0xff]  ;;  %1524 = vmatprep.subr.msk.mxu1 %vm39_vm0, %v20_v0  ;;  %v1802_v6 = vld [vmem:[%s2065_s2 + $0xf] sm:$0xff]  ;;  %vm330_vm5 = vcmask 257026   ;;  %vm554_vm6 = vcmask 261126   ;;  %vm442_vm7 = vcmask 259076   ;;  %1409 = vst [vmem:[%s2069_s5 + $0x8] sm:$0xff] %v1732_v3 }
   0x3   :  { %1526 = vmatprep.mubr.msk.f32.mxu1 %vm32_vm1, %v26_v1  ;;  %v1786_v4 = vld [vmem:[%s2065_s2 + $0x1f] sm:$0xff]  ;;  %1525 = vmatpush3.msk.msra.mxu1 %vm39_vm0, %v20_v0  ;;  %v1811_v7 = vld [vmem:[%s2065_s2 + $0x7] sm:$0xff]  ;;  %s1737_s7 = smov 120   ;;  %vm1231_vm8 = vcmask 64512   ;;  %s1740_s16 = smov 48   ;;  %vm1420_vm9 = vcmask 113728  }
   0x4   :  { %1541 = vmatpush3.msra.mxu0 %v1786_v4  ;;  %1527 = vmatmul.mubr.msk.f32.vlgmr.msra.gmra.mxu1 %vm32_vm1, %v27_v2  ;;  %v1430_v8 = vld [vmem:[%s2065_s2 + $0x6] ss:$0 sm:$0xff]  ;;  %s1735_s2 = smov 32   ;;  %vm1423_vm10 = vcmask 121968  }
   0x5   :  { %1529 = vmatprep.subr.mxu1 %v1732_v3  ;;  %1537 = vmatprep.mubr.msk.f32.mxu1 %vm1733_vm2, %v1732_v3 }
   0x6   :  { %1530 = vmatpush3.msra.mxu1 %v1786_v4  ;;  %1542 = vmatprep.subr.mxu0 %v1732_v3 }
   0x7   :  { %1531 = vmatprep.subr.mxu1 %v1732_v3  ;;  %1543 = vmatpush3.msra.mxu0 %v1793_v5 }
   0x8   :  { %1532 = vmatpush3.msra.mxu1 %v1793_v5  ;;  %1544 = vmatprep.subr.mxu0 %v1732_v3 }
   0x9   :  { %1533 = vmatprep.subr.mxu1 %v1732_v3  ;;  %1545 = vmatpush3.msra.mxu0 %v1802_v6 }
   0xa   :  { %1534 = vmatpush3.msra.mxu1 %v1802_v6  ;;  %1546 = vmatprep.subr.mxu0 %v1732_v3 }
   0xb   :  { %1535 = vmatprep.subr.mxu1 %v1732_v3  ;;  %1547 = vmatpush3.msra.mxu0 %v1811_v7 }
   0xc   :  { %1536 = vmatpush3.msra.mxu1 %v1811_v7  ;;  %1562 = vmatprep.subr.mxu0 %v1732_v3 }
   0xd   :  { %1538 = vmatmul.mubr.f32.vlgmr.msra.gmra.mxu1 %v1732_v3  ;;  %1551 = vmatprep.subr.mxu1 %v1732_v3 }
   0xe   :  { %1552 = vmatpush3.msra.mxu1 %v1786_v4  ;;  %1559 = vmatprep.mubr.msk.f32.mxu1 %vm1733_vm2, %v1732_v3 }
   0xf   :  { %1553 = vmatprep.subr.mxu1 %v1732_v3 }
  0x10   :  { %1554 = vmatpush3.msra.mxu1 %v1793_v5 }
  0x11   :  { %1555 = vmatprep.subr.mxu1 %v1732_v3 }
  0x12   :  { %1556 = vmatpush3.msra.mxu1 %v1802_v6 }
  0x13   :  { %1557 = vmatprep.subr.mxu1 %v1732_v3 }
  0x14   :  { %1558 = vmatpush3.msra.mxu1 %v1811_v7 }
  0x15   :  { %1573 = vmatprep.subr.mxu1 %v1732_v3 }
  0xc4   :  { %v1528_v9 = vpop.f32.mrf.mxu1 }
  0xc5   :  { %v1836_v10 = vadd.f32 %v1528_v9, %v1430_v8 }
  0xc6   :  { %v109_v11 = vpop.f32.mrf.mxu1 }
  0xc7   :  { %v1838_v12 = vadd.f32 %v1430_v8, %v109_v11 }
  0xcd   :  { %v188_v13 = vpop.f32.mrf.mxu1 }
  0xce   :  { %v192_v14 = vadd.f32 %v188_v13, %v1838_v12 }
  0xcf   :  { %v1539_v15 = vpop.f32.mrf.mxu1 }
  0xd0   :  { %1664 = vtanh.f32 %v192_v14  ;;  %v1434_v17 = vmul.f32 -1.442695, %v192_v14 }
  0xd2   :  { %1666 = vpow2.f32 %v1434_v17 }
  0xdd   :  { %v1665_v16 = vpop.eup %1664 }
  0xde   :  { %202 = vrot.lane.b32.xlu0 %v1665_v16, %s1734_s8 }
  0xdf   :  { %v1667_v18 = vpop.eup %1666 }
  0xe0   :  { %v196_v19 = vadd.f32 1.0, %v1667_v18 }
  0xe2   :  { %1668 = vrcp.f32 %v196_v19 }
  0xef   :  { %v1669_v20 = vpop.eup %1668 }
  0xf0   :  { %v200_v23 = vmul.f32 0.0, %v1669_v20 }
 0x150   :  { %v203_v21 = vpop.permute.xlu0 %202 }
 0x151   :  { %v205_v22 = vmul.f32 %v1669_v20, %v203_v21 }
 0x153   :  { %207 = vrot.lane.b32.xlu0 %v205_v22, %s1735_s2 }
 0x1c5   :  { %v208_v24 = vpop.permute.xlu0 %207 }
 0x1c6   :  { %v210_v25 = vadd.f32 %v208_v24, %v200_v23 }
 0x1c8   :  { %1670 = vtanh.f32 %v210_v25  ;;  %v307_v41 = vrot.slane %v210_v25, 6 }
 0x1d5   :  { %v1671_v26 = vpop.eup %1670 }
 0x1d6   :  { %213 = vrot.lane.b32.xlu1 %v1671_v26, %s1734_s8 }
 0x248   :  { %v214_v27 = vpop.permute.xlu1 %213 }
 0x249   :  { %v216_v28 = vmul.f32 %v1669_v20, %v214_v27 }
 0x24b   :  { %218 = vrot.lane.b32.xlu1 %v216_v28, %s1735_s2 }
 0x2bd   :  { %v219_v29 = vpop.permute.xlu1 %218 }
 0x2be   :  { %222 = vst.msk [vmem:[#allocation2] sm:$0x3] %vm221_vm3, %v219_v29  ;;  %1549 = vmatmul.mubr.msk.f32.vlgmr.msra.gmra.mxu0 %vm118_vm4, %v219_v29 }
 0x2bf   :  { %1563 = vmatpush3.msra.mxu0 %v1786_v4  ;;  %1570 = vmatprep.mubr.msk.f32.mxu0 %vm1733_vm2, %v1732_v3 }
 0x2c0   :  { %1564 = vmatprep.subr.mxu0 %v1732_v3 }
 0x2c1   :  { %1565 = vmatpush3.msra.mxu0 %v1793_v5 }
 0x2c2   :  { %1566 = vmatprep.subr.mxu0 %v1732_v3 }
 0x2c3   :  { %1567 = vmatpush3.msra.mxu0 %v1802_v6 }
 0x2c4   :  { %1568 = vmatprep.subr.mxu0 %v1732_v3 }
 0x2c5   :  { %1569 = vmatpush3.msra.mxu0 %v1811_v7 }
 0x2c6   :  { %1584 = vmatprep.subr.mxu0 %v1732_v3 }
 0x37e   :  { %v291_v30 = vpop.f32.mrf.mxu0 }
 0x37f   :  { %v296_v31 = vrot.slane %v291_v30, 6 }
 0x380   :  { %v1550_v32 = vpop.f32.mrf.mxu0 }
 0x381   :  { %v298_v33 = vadd.f32 %v296_v31, %v1838_v12 }
 0x383   :  { %1672 = vtanh.f32 %v298_v33  ;;  %v1436_v35 = vmul.f32 -1.442695, %v298_v33 }
 0x385   :  { %1674 = vpow2.f32 %v1436_v35 }
 0x390   :  { %v1673_v34 = vpop.eup %1672 }
 0x391   :  { %311 = vrot.lane.b32.xlu0 %v1673_v34, %s1734_s8 }
 0x392   :  { %v1675_v36 = vpop.eup %1674 }
 0x393   :  { %v302_v37 = vadd.f32 1.0, %v1675_v36 }
 0x395   :  { %1676 = vrcp.f32 %v302_v37 }
 0x3a2   :  { %v1677_v38 = vpop.eup %1676 }
 0x3a3   :  { %v309_v42 = vmul.f32 %v1677_v38, %v307_v41 }
 0x403   :  { %v312_v39 = vpop.permute.xlu0 %311 }
 0x404   :  { %v314_v40 = vmul.f32 %v1677_v38, %v312_v39 }
 0x406   :  { %316 = vrot.lane.b32.xlu1 %v314_v40, %s1735_s2 }
 0x478   :  { %v317_v43 = vpop.permute.xlu1 %316 }
 0x479   :  { %v319_v44 = vadd.f32 %v317_v43, %v309_v42 }
 0x47b   :  { %1678 = vtanh.f32 %v319_v44  ;;  %v419_v61 = vrot.slane %v319_v44, 6 }
 0x488   :  { %v1679_v45 = vpop.eup %1678 }
 0x489   :  { %322 = vrot.lane.b32.xlu0 %v1679_v45, %s1734_s8 }
 0x4fb   :  { %v323_v46 = vpop.permute.xlu0 %322 }
 0x4fc   :  { %v1861_v47 = vmul.f32 %v1677_v38, %v323_v46 }
 0x4fe   :  { %v332_v48 = vrot.slane %v1861_v47, 2 }
 0x500   :  { %333 = vrot.lane.b32.xlu1 %v332_v48, %s1735_s2 }
 0x572   :  { %v334_v49 = vpop.permute.xlu1 %333 }
 0x573   :  { %1560 = vmatmul.mubr.msk.f32.vlgmr.msra.gmra.mxu1 %vm118_vm4, %v334_v49 }
 0x574   :  { %1574 = vmatpush3.msra.mxu1 %v1786_v4  ;;  %1581 = vmatprep.mubr.msk.f32.mxu1 %vm1733_vm2, %v1732_v3 }
 0x575   :  { %1575 = vmatprep.subr.mxu1 %v1732_v3 }
 0x576   :  { %1576 = vmatpush3.msra.mxu1 %v1793_v5 }
 0x577   :  { %1577 = vmatprep.subr.mxu1 %v1732_v3 }
 0x578   :  { %1578 = vmatpush3.msra.mxu1 %v1802_v6 }
 0x579   :  { %1579 = vmatprep.subr.mxu1 %v1732_v3 }
 0x57a   :  { %1580 = vmatpush3.msra.mxu1 %v1811_v7 }
 0x57b   :  { %1595 = vmatprep.subr.mxu1 %v1732_v3 }
 0x633   :  { %v403_v50 = vpop.f32.mrf.mxu1 }
 0x634   :  { %v408_v51 = vrot.slane %v403_v50, 4 }
 0x635   :  { %v1561_v52 = vpop.f32.mrf.mxu1 }
 0x636   :  { %v410_v53 = vadd.f32 %v408_v51, %v1838_v12 }
 0x638   :  { %1680 = vtanh.f32 %v410_v53  ;;  %v1438_v55 = vmul.f32 -1.442695, %v410_v53 }
 0x63a   :  { %1682 = vpow2.f32 %v1438_v55 }
 0x645   :  { %v1681_v54 = vpop.eup %1680 }
 0x646   :  { %423 = vrot.lane.b32.xlu0 %v1681_v54, %s1734_s8 }
 0x647   :  { %v1683_v56 = vpop.eup %1682 }
 0x648   :  { %v414_v57 = vadd.f32 1.0, %v1683_v56 }
 0x64a   :  { %1684 = vrcp.f32 %v414_v57 }
 0x657   :  { %v1685_v58 = vpop.eup %1684 }
 0x658   :  { %v421_v62 = vmul.f32 %v1685_v58, %v419_v61 }
 0x6b8   :  { %v424_v59 = vpop.permute.xlu0 %423 }
 0x6b9   :  { %v426_v60 = vmul.f32 %v1685_v58, %v424_v59 }
 0x6bb   :  { %428 = vrot.lane.b32.xlu1 %v426_v60, %s1735_s2 }
 0x72d   :  { %v429_v63 = vpop.permute.xlu1 %428 }
 0x72e   :  { %v431_v0 = vadd.f32 %v429_v63, %v421_v62 }
 0x730   :  { %1686 = vtanh.f32 %v431_v0  ;;  %v531_v24 = vrot.slane %v431_v0, 6 }
 0x73d   :  { %v1687_v1 = vpop.eup %1686 }
 0x73e   :  { %434 = vrot.lane.b32.xlu0 %v1687_v1, %s1734_s8 }
 0x7b0   :  { %v435_v2 = vpop.permute.xlu0 %434 }
 0x7b1   :  { %v1880_v8 = vmul.f32 %v1685_v58, %v435_v2 }
 0x7b3   :  { %v444_v9 = vrot.slane %v1880_v8, 4 }
 0x7b5   :  { %445 = vrot.lane.b32.xlu1 %v444_v9, %s1735_s2 }
 0x827   :  { %v446_v11 = vpop.permute.xlu1 %445 }
 0x828   :  { %1571 = vmatmul.mubr.msk.f32.vlgmr.msra.gmra.mxu0 %vm118_vm4, %v446_v11 }
 0x829   :  { %1585 = vmatpush3.msra.mxu0 %v1786_v4  ;;  %1592 = vmatprep.mubr.msk.f32.mxu0 %vm1733_vm2, %v1732_v3 }
 0x82a   :  { %1586 = vmatprep.subr.mxu0 %v1732_v3 }
 0x82b   :  { %1587 = vmatpush3.msra.mxu0 %v1793_v5 }
 0x82c   :  { %1588 = vmatprep.subr.mxu0 %v1732_v3 }
 0x82d   :  { %1589 = vmatpush3.msra.mxu0 %v1802_v6 }
 0x82e   :  { %1590 = vmatprep.subr.mxu0 %v1732_v3 }
 0x82f   :  { %1591 = vmatpush3.msra.mxu0 %v1811_v7 }
 0x830   :  { %1606 = vmatprep.subr.mxu0 %v1732_v3 }
 0x8e8   :  { %v515_v13 = vpop.f32.mrf.mxu0 }
 0x8e9   :  { %v520_v14 = vrot.slane %v515_v13, 2 }
 0x8ea   :  { %v1572_v15 = vpop.f32.mrf.mxu0 }
 0x8eb   :  { %v522_v16 = vadd.f32 %v520_v14, %v1838_v12 }
 0x8ed   :  { %1688 = vtanh.f32 %v522_v16  ;;  %v1440_v18 = vmul.f32 -1.442695, %v522_v16 }
 0x8ef   :  { %1690 = vpow2.f32 %v1440_v18 }
 0x8fa   :  { %v1689_v17 = vpop.eup %1688 }
 0x8fb   :  { %535 = vrot.lane.b32.xlu0 %v1689_v17, %s1734_s8 }
 0x8fc   :  { %v1691_v19 = vpop.eup %1690 }
 0x8fd   :  { %v526_v20 = vadd.f32 1.0, %v1691_v19 }
 0x8ff   :  { %1692 = vrcp.f32 %v526_v20 }
 0x90c   :  { %v1693_v21 = vpop.eup %1692 }
 0x90d   :  { %v533_v25 = vmul.f32 %v1693_v21, %v531_v24 }
 0x96d   :  { %v536_v22 = vpop.permute.xlu0 %535 }
 0x96e   :  { %v538_v23 = vmul.f32 %v1693_v21, %v536_v22 }
 0x970   :  { %540 = vrot.lane.b32.xlu1 %v538_v23, %s1735_s2 }
 0x9e2   :  { %v541_v26 = vpop.permute.xlu1 %540 }
 0x9e3   :  { %v543_v27 = vadd.f32 %v541_v26, %v533_v25 }
 0x9e5   :  { %1694 = vtanh.f32 %v543_v27  ;;  %v640_v42 = vrot.slane %v543_v27, 6 }
 0x9f2   :  { %v1695_v12 = vpop.eup %1694 }
 0x9f3   :  { %546 = vrot.lane.b32.xlu0 %v1695_v12, %s1734_s8 }
 0xa65   :  { %v547_v28 = vpop.permute.xlu0 %546 }
 0xa66   :  { %v1899_v29 = vmul.f32 %v1693_v21, %v547_v28 }
 0xa68   :  { %v556_v30 = vrot.slane %v1899_v29, 6 }
 0xa6a   :  { %557 = vrot.lane.b32.xlu1 %v556_v30, %s1735_s2 }
 0xadc   :  { %v558_v31 = vpop.permute.xlu1 %557 }
 0xadd   :  { %1582 = vmatmul.mubr.msk.f32.vlgmr.msra.gmra.mxu1 %vm118_vm4, %v558_v31 }
 0xade   :  { %1596 = vmatpush3.msra.mxu1 %v1786_v4  ;;  %1603 = vmatprep.mubr.msk.f32.mxu1 %vm1733_vm2, %v1732_v3 }
 0xadf   :  { %1597 = vmatprep.subr.mxu1 %v1732_v3 }
 0xae0   :  { %1598 = vmatpush3.msra.mxu1 %v1793_v5 }
 0xae1   :  { %1599 = vmatprep.subr.mxu1 %v1732_v3 }
 0xae2   :  { %1600 = vmatpush3.msra.mxu1 %v1802_v6 }
 0xae3   :  { %1601 = vmatprep.subr.mxu1 %v1732_v3 }
 0xae4   :  { %1602 = vmatpush3.msra.mxu1 %v1811_v7 }
 0xb9d   :  { %v627_v32 = vpop.f32.mrf.mxu1 }
 0xb9e   :  { %v631_v33 = vadd.f32 %v627_v32, %v1836_v10 }
 0xb9f   :  { %v1583_v34 = vpop.f32.mrf.mxu1 }
 0xba0   :  { %1696 = vtanh.f32 %v631_v33  ;;  %v1442_v36 = vmul.f32 -1.442695, %v631_v33 }
 0xba2   :  { %1698 = vpow2.f32 %v1442_v36 }
 0xbad   :  { %v1697_v35 = vpop.eup %1696 }
 0xbae   :  { %644 = vrot.lane.b32.xlu0 %v1697_v35, %s1734_s8 }
 0xbaf   :  { %v1699_v37 = vpop.eup %1698 }
 0xbb0   :  { %v635_v38 = vadd.f32 1.0, %v1699_v37 }
 0xbb2   :  { %1700 = vrcp.f32 %v635_v38 }
 0xbbf   :  { %v1701_v39 = vpop.eup %1700 }
 0xbc0   :  { %v642_v43 = vmul.f32 %v1701_v39, %v640_v42 }
 0xc20   :  { %v645_v40 = vpop.permute.xlu0 %644 }
 0xc21   :  { %v647_v41 = vmul.f32 %v1701_v39, %v645_v40 }
 0xc23   :  { %649 = vrot.lane.b32.xlu1 %v647_v41, %s1735_s2 }
 0xc95   :  { %v650_v44 = vpop.permute.xlu1 %649 }
 0xc96   :  { %v652_v45 = vadd.f32 %v650_v44, %v642_v43 }
 0xc98   :  { %1702 = vtanh.f32 %v652_v45 }
 0xca5   :  { %v1703_v46 = vpop.eup %1702 }
 0xca6   :  { %655 = vrot.lane.b32.xlu0 %v1703_v46, %s1734_s8 }
 0xd18   :  { %v656_v48 = vpop.permute.xlu0 %655 }
 0xd19   :  { %v658_v49 = vmul.f32 %v1701_v39, %v656_v48  ;;  %v999_v48 = vld [vmem:[%s2067_s3 + $0x18] sm:$0xff] }
 0xd1a   :  { %1617 = vmatprep.subr.mxu1 %v999_v48 }
 0xd1b   :  { %660 = vrot.lane.b32.xlu1 %v658_v49, %s1735_s2  ;;  %v998_v49 = vld [vmem:[%s2067_s3 + $0x10] sm:$0xff] }
 0xd8d   :  { %v661_v50 = vpop.permute.xlu1 %660 }
 0xd8e   :  { %663 = vst.msk [vmem:[#allocation2 + $0x8] sm:$0x3] %vm221_vm3, %v661_v50  ;;  %1593 = vmatmul.mubr.msk.f32.vlgmr.msra.gmra.mxu0 %vm118_vm4, %v661_v50  ;;  %v997_v50 = vld [vmem:[%s2067_s3 + $0x8] sm:$0xff] }
 0xd8f   :  { %1607 = vmatpush3.msra.mxu0 %v1786_v4  ;;  %1614 = vmatprep.mubr.msk.f32.mxu0 %vm1733_vm2, %v1732_v3 }
 0xd90   :  { %1608 = vmatprep.subr.mxu0 %v1732_v3 }
 0xd91   :  { %1609 = vmatpush3.msra.mxu0 %v1793_v5 }
 0xd92   :  { %1610 = vmatprep.subr.mxu0 %v1732_v3 }
 0xd93   :  { %1611 = vmatpush3.msra.mxu0 %v1802_v6 }
 0xd94   :  { %1612 = vmatprep.subr.mxu0 %v1732_v3 }
 0xd95   :  { %1613 = vmatpush3.msra.mxu0 %v1811_v7  ;;  %v748_v7 = vrot.slane %v652_v45, 6 }
 0xe4e   :  { %v732_v51 = vpop.f32.mrf.mxu0 }
 0xe4f   :  { %v737_v52 = vrot.slane %v732_v51, 6 }
 0xe50   :  { %v1594_v53 = vpop.f32.mrf.mxu0 }
 0xe51   :  { %v739_v4 = vadd.f32 %v737_v52, %v1836_v10 }
 0xe53   :  { %1704 = vtanh.f32 %v739_v4  ;;  %v1444_v55 = vmul.f32 -1.442695, %v739_v4 }
 0xe55   :  { %1706 = vpow2.f32 %v1444_v55 }
 0xe60   :  { %v1705_v54 = vpop.eup %1704 }
 0xe61   :  { %752 = vrot.lane.b32.xlu0 %v1705_v54, %s1734_s8 }
 0xe62   :  { %v1707_v5 = vpop.eup %1706 }
 0xe63   :  { %v743_v56 = vadd.f32 1.0, %v1707_v5 }
 0xe65   :  { %1708 = vrcp.f32 %v743_v56  ;;  %v1003_v56 = vld [vmem:[%s2067_s3 + $0x38] sm:$0xff] }
 0xe66   :  { %1628 = vmatprep.subr.mxu0 %v1003_v56 }
 0xe72   :  { %v1709_v57 = vpop.eup %1708 }
 0xe73   :  { %v750_v59 = vmul.f32 %v1709_v57, %v748_v7  ;;  %v1993_v7 = vld [vmem:[%s2068_s4] ss:$0 sm:$0xff] }
 0xed3   :  { %v753_v6 = vpop.permute.xlu0 %752 }
 0xed4   :  { %v755_v58 = vmul.f32 %v1709_v57, %v753_v6  ;;  %v1001_v6 = vld [vmem:[%s2067_s3 + $0x28] sm:$0xff] }
 0xed6   :  { %757 = vrot.lane.b32.xlu1 %v755_v58, %s1735_s2  ;;  %v1000_v58 = vld [vmem:[%s2067_s3 + $0x20] sm:$0xff] }
 0xf48   :  { %v758_v60 = vpop.permute.xlu1 %757 }
 0xf49   :  { %v760_v61 = vadd.f32 %v758_v60, %v750_v59 }
 0xf4b   :  { %1710 = vtanh.f32 %v760_v61  ;;  %v859_v22 = vrot.slane %v760_v61, 6 }
 0xf58   :  { %v1711_v62 = vpop.eup %1710 }
 0xf59   :  { %763 = vrot.lane.b32.xlu0 %v1711_v62, %s1734_s8 }
 0xfcb   :  { %v764_v63 = vpop.permute.xlu0 %763 }
 0xfcc   :  { %v1933_v0 = vmul.f32 %v1709_v57, %v764_v63  ;;  %v1002_v57 = vld [vmem:[%s2067_s3 + $0x30] sm:$0xff] }
 0xfce   :  { %v772_v1 = vrot.slane %v1933_v0, 2 }
 0xfd0   :  { %773 = vrot.lane.b32.xlu1 %v772_v1, %s1735_s2 }
0x1042   :  { %v774_v2 = vpop.permute.xlu1 %773 }
0x1043   :  { %1604 = vmatmul.mubr.msk.f32.vlgmr.msra.gmra.mxu1 %vm118_vm4, %v774_v2 }
0x1044   :  { %1618 = vmatpush3.msra.mxu1 %v999_v48 }
0x1045   :  { %1619 = vmatprep.subr.mxu1 %v998_v49 }
0x1046   :  { %1620 = vmatpush3.msra.mxu1 %v998_v49 }
0x1047   :  { %1621 = vmatprep.subr.mxu1 %v997_v50 }
0x1048   :  { %1622 = vmatpush3.msra.mxu1 %v997_v50 }
0x1103   :  { %v843_v9 = vpop.f32.mrf.mxu1 }
0x1104   :  { %v848_v11 = vrot.slane %v843_v9, 4 }
0x1105   :  { %v1605_v13 = vpop.f32.mrf.mxu1 }
0x1106   :  { %v850_v14 = vadd.f32 %v848_v11, %v1836_v10 }
0x1108   :  { %1712 = vtanh.f32 %v850_v14  ;;  %v1446_v16 = vmul.f32 -1.442695, %v850_v14 }
0x110a   :  { %1714 = vpow2.f32 %v1446_v16 }
0x1115   :  { %v1713_v15 = vpop.eup %1712 }
0x1116   :  { %863 = vrot.lane.b32.xlu0 %v1713_v15, %s1734_s8 }
0x1117   :  { %v1715_v17 = vpop.eup %1714 }
0x1118   :  { %v854_v18 = vadd.f32 1.0, %v1715_v17 }
0x111a   :  { %1716 = vrcp.f32 %v854_v18  ;;  %v1004_v18 = vld [vmem:[%s2067_s3 + $0x40] sm:$0xff] }
0x1127   :  { %v1717_v19 = vpop.eup %1716 }
0x1128   :  { %v861_v23 = vmul.f32 %v1717_v19, %v859_v22  ;;  %v1190_v22 = vld [vmem:[%s2070_s1 + $0x8] sm:$0xff] }
0x1188   :  { %v864_v20 = vpop.permute.xlu0 %863 }
0x1189   :  { %v866_v21 = vmul.f32 %v1717_v19, %v864_v20 }
0x118b   :  { %868 = vrot.lane.b32.xlu1 %v866_v21, %s1735_s2 }
0x11fd   :  { %v869_v24 = vpop.permute.xlu1 %868 }
0x11fe   :  { %v871_v25 = vadd.f32 %v869_v24, %v861_v23  ;;  %v1189_v24 = vld [vmem:[%s2070_s1] sm:$0xff] }
0x1200   :  { %1718 = vtanh.f32 %v871_v25 }
0x120d   :  { %v1719_v26 = vpop.eup %1718 }
0x120e   :  { %874 = vrot.lane.b32.xlu0 %v1719_v26, %s1734_s8 }
0x1280   :  { %v875_v27 = vpop.permute.xlu0 %874 }
0x1281   :  { %v877_v12 = vmul.f32 %v1717_v19, %v875_v27 }
0x1283   :  { %v883_v28 = vrot.slane %v877_v12, 4 }
0x1285   :  { %884 = vrot.lane.b32.xlu1 %v883_v28, %s1735_s2 }
0x12f7   :  { %v885_v30 = vpop.permute.xlu1 %884 }
0x12f8   :  { %1615 = vmatmul.mubr.msk.f32.vlgmr.msra.gmra.mxu0 %vm118_vm4, %v885_v30 }
0x12f9   :  { %1629 = vmatpush3.msra.mxu0 %v1003_v56 }
0x12fa   :  { %1630 = vmatprep.subr.mxu0 %v1002_v57 }
0x12fb   :  { %1631 = vmatpush3.msra.mxu0 %v1002_v57 }
0x12fc   :  { %1632 = vmatprep.subr.mxu0 %v1001_v6 }
0x12fd   :  { %1633 = vmatpush3.msra.mxu0 %v1001_v6 }
0x12fe   :  { %1634 = vmatprep.subr.mxu0 %v1000_v58 }
0x12ff   :  { %1635 = vmatpush3.msra.mxu0 %v1000_v58 }
0x13b8   :  { %v954_v31 = vpop.f32.mrf.mxu0 }
0x13b9   :  { %v959_v32 = vrot.slane %v954_v31, 2 }
0x13ba   :  { %v1616_v33 = vpop.f32.mrf.mxu0 }
0x13bb   :  { %v961_v34 = vadd.f32 %v959_v32, %v1836_v10  ;;  %v970_v10 = vrot.slane %v871_v25, 6 }
0x13bd   :  { %1720 = vtanh.f32 %v961_v34  ;;  %v1448_v36 = vmul.f32 -1.442695, %v961_v34 }
0x13bf   :  { %1722 = vpow2.f32 %v1448_v36 }
0x13ca   :  { %v1721_v35 = vpop.eup %1720 }
0x13cb   :  { %974 = vrot.lane.b32.xlu0 %v1721_v35, %s1734_s8 }
0x13cc   :  { %v1723_v37 = vpop.eup %1722 }
0x13cd   :  { %v965_v38 = vadd.f32 1.0, %v1723_v37 }
0x13cf   :  { %1724 = vrcp.f32 %v965_v38 }
0x13dc   :  { %v1725_v39 = vpop.eup %1724 }
0x13dd   :  { %v972_v42 = vmul.f32 %v1725_v39, %v970_v10 }
0x143d   :  { %v975_v40 = vpop.permute.xlu0 %974 }
0x143e   :  { %v977_v41 = vmul.f32 %v1725_v39, %v975_v40 }
0x1440   :  { %979 = vrot.lane.b32.xlu1 %v977_v41, %s1735_s2 }
0x1444   :  { %327 = vrot.lane.b32.xlu1 %v1861_v47, %s1735_s2 }
0x1448   :  { %551 = vrot.lane.b32.xlu1 %v1899_v29, %s1735_s2 }
0x144c   :  { %879 = vrot.lane.b32.xlu1 %v877_v12, %s1735_s2 }
0x1450   :  { %1099 = vrot.lane.b32.xlu1 %v1993_v7, %s1736_s26 }
0x14b2   :  { %v980_v43 = vpop.permute.xlu1 %979 }
0x14b3   :  { %v982_v44 = vadd.f32 %v980_v43, %v972_v42  ;;  %v1008_v42 = vld [vmem:[%s2067_s3 + $0x60] sm:$0xff]  ;;  %v1007_v43 = vld [vmem:[%s2067_s3 + $0x58] sm:$0xff] }
0x14b4   :  { %1644 = vmatprep.subr.mxu0 %v1008_v42 }
0x14b5   :  { %1726 = vtanh.f32 %v982_v44  ;;  %v1006_v44 = vld [vmem:[%s2067_s3 + $0x50] sm:$0xff] }
0x14b6   :  { %v328_v45 = vpop.permute.xlu1 %327 }
0x14b7   :  { %331 = vst.msk [vmem:[#allocation2] sm:$0xc] %vm330_vm5, %v328_v45  ;;  %v1005_v45 = vld [vmem:[%s2067_s3 + $0x48] sm:$0xff] }
0x14ba   :  { %v552_v46 = vpop.permute.xlu1 %551 }
0x14bb   :  { %555 = vst.msk [vmem:[#allocation2] sm:$0xc0] %vm554_vm6, %v552_v46 }
0x14be   :  { %v880_v47 = vpop.permute.xlu1 %879 }
0x14bf   :  { %882 = vst.msk [vmem:[#allocation2 + $0x8] sm:$0x30] %vm442_vm7, %v880_v47 }
0x14c2   :  { %v1727_v29 = vpop.eup %1726  ;;  %v1100_v1 = vpop.permute.xlu1 %1099 }
0x14c3   :  { %985 = vrot.lane.b32.xlu0 %v1727_v29, %s1734_s8  ;;  %s1738_s8 = smov 8  }
0x14c7   :  { %439 = vrot.lane.b32.xlu0 %v1880_v8, %s1735_s2  ;;  %v996_v8 = vld [vmem:[%s2067_s3] sm:$0xff] }
0x14c8   :  { %1623 = vmatprep.subr.mxu1 %v996_v8 }
0x14c9   :  { %1624 = vmatpush3.msra.mxu1 %v996_v8 }
0x14ca   :  { %1639 = vmatprep.subr.mxu1 %v1004_v18 }
0x14cb   :  { %768 = vrot.lane.b32.xlu0 %v1933_v0, %s1735_s2 }
0x1535   :  { %v986_v51 = vpop.permute.xlu0 %985 }
0x1536   :  { %v988_v52 = vmul.f32 %v1725_v39, %v986_v51 }
0x1538   :  { %990 = vrot.lane.b32.xlu0 %v988_v52, %s1735_s2  ;;  %s1739_s2 = smov 80  }
0x1539   :  { %v440_v53 = vpop.permute.xlu0 %439 }
0x153a   :  { %443 = vst.msk [vmem:[#allocation2] sm:$0x30] %vm442_vm7, %v440_v53 }
0x153d   :  { %v769_v4 = vpop.permute.xlu0 %768 }
0x153e   :  { %771 = vst.msk [vmem:[#allocation2 + $0x8] sm:$0xc] %vm330_vm5, %v769_v4 }
0x1541   :  { %v994_v54 = vld [vmem:[#allocation2] sm:$0xff] }
0x1542   :  { %1625 = vmatprep.mubr.msk.f32.mxu1 %vm118_vm4, %v994_v54 }
0x15aa   :  { %v991_v55 = vpop.permute.xlu0 %990 }
0x15ab   :  { %993 = vst.msk [vmem:[#allocation2 + $0x8] sm:$0xc0] %vm554_vm6, %v991_v55 }
0x15b2   :  { %v995_v5 = vld [vmem:[#allocation2 + $0x8] sm:$0xff] }
0x15b3   :  { %1626 = vmatmul.mubr.msk.f32.vlgmr.msra.gmra.mxu1 %vm118_vm4, %v995_v5 }
0x15b4   :  { %1640 = vmatpush3.msra.mxu1 %v1004_v18 }
0x1673   :  { %v1627_v59 = vpop.f32.mrf.mxu1 }
0x1674   :  { %v1094_v60 = vadd.f32 %v1627_v59, %v1993_v7 }
0x1675   :  { %v1088_v61 = vpop.f32.mrf.mxu1 }
0x1676   :  { %v1089_v62 = vadd.f32 %v1993_v7, %v1088_v61  ;;  %v1098_v0 = vmax.f32 %v1094_v60, 0.0 }
0x1678   :  { %v1097_v63 = vmax.f32 %v1089_v62, 0.0 }
0x167a   :  { %1636 = vmatprep.mubr.msk.f32.mxu0 %vm118_vm4, %v1097_v63 }
0x167b   :  { %1637 = vmatmul.mubr.msk.f32.vlgmr.msra.gmra.mxu0 %vm118_vm4, %v1098_v0 }
0x167c   :  { %1645 = vmatpush3.msra.mxu0 %v1008_v42 }
0x167d   :  { %1646 = vmatprep.subr.mxu0 %v1007_v43 }
0x167e   :  { %1647 = vmatpush3.msra.mxu0 %v1007_v43 }
0x167f   :  { %1648 = vmatprep.subr.mxu0 %v1006_v44 }
0x1680   :  { %1649 = vmatpush3.msra.mxu0 %v1006_v44 }
0x1681   :  { %1650 = vmatprep.subr.mxu0 %v1005_v45 }
0x1682   :  { %1651 = vmatpush3.msra.mxu0 %v1005_v45 }
0x173b   :  { %v1638_v2 = vpop.f32.mrf.mxu0 }
0x173c   :  { %v1180_v9 = vadd.f32 %v1638_v2, %v1100_v1 }
0x173d   :  { %v1174_v11 = vpop.f32.mrf.mxu0 }
0x173e   :  { %v1184_v13 = vmul.f32 0.5, %v1180_v9  ;;  %v1175_v14 = vadd.f32 %v1174_v11, %v1100_v1  ;;  %v1206_v3 = vmul.f32 %v1180_v9, %v1180_v9 }
0x1740   :  { %v1187_v15 = vmul.f32 1.442695, %v1184_v13  ;;  %v1183_v16 = vmul.f32 0.5, %v1175_v14  ;;  %v1205_v21 = vmul.f32 %v1175_v14, %v1175_v14 }
0x1742   :  { %1728 = vpow2.f32 %v1187_v15  ;;  %v1185_v17 = vmul.f32 1.442695, %v1183_v16 }
0x1744   :  { %1730 = vpow2.f32 %v1185_v17 }
0x174f   :  { %v1729_v19 = vpop.eup %1728 }
0x1750   :  { %1195 = vrot.lane.b32.xlu1 %v1729_v19, %s1737_s7  ;;  %v1204_v36 = vmul.f32 %v1729_v19, %v1729_v19 }
0x1751   :  { %v1731_v20 = vpop.eup %1730 }
0x1752   :  { %1193 = vrot.lane.b32.xlu0 %v1731_v20, %s1737_s7  ;;  %v1203_v28 = vmul.f32 %v1731_v20, %v1731_v20 }
0x1754   :  { %1209 = vrot.lane.b32.xlu1 %v1205_v21, %s1738_s8 }
0x1756   :  { %1238 = vrot.lane.b32.xlu0 %v1993_v7, %s1739_s2 }
0x175a   :  { %1211 = vrot.lane.b32.xlu0 %v1206_v3, %s1738_s8 }
0x17c2   :  { %v1196_v23 = vpop.permute.xlu1 %1195 }
0x17c3   :  { %v1200_v25 = vmul.f32 %v1196_v23, %v1190_v22 }
0x17c4   :  { %v1194_v26 = vpop.permute.xlu0 %1193 }
0x17c5   :  { %v1202_v27 = vadd.f32 %v1200_v25, %v1180_v9  ;;  %v1199_v12 = vmul.f32 %v1194_v26, %v1189_v24 }
0x17c6   :  { %v1210_v30 = vpop.permute.xlu1 %1209 }
0x17c7   :  { %v1201_v31 = vadd.f32 %v1199_v12, %v1175_v14  ;;  %v1215_v32 = vadd.f32 %v1210_v30, %v1203_v28  ;;  %1411 = vst.msk [vmem:[%s2069_s5 + $0x8] sm:$0xff] %vm1231_vm8, %v1202_v27 }
0x17c8   :  { %v1239_v33 = vpop.permute.xlu0 %1238 }
0x17c9   :  { %v1217_v34 = vsub.f32 %v1215_v32, %v1175_v14  ;;  %1641 = vmatprep.mubr.msk.f32.mxu1 %vm1231_vm8, %v1201_v31  ;;  %1410 = vst.msk [vmem:[%s2069_s5] sm:$0xff] %vm1231_vm8, %v1201_v31 }
0x17ca   :  { %1642 = vmatmul.mubr.msk.f32.vlgmr.msra.gmra.mxu1 %vm1231_vm8, %v1202_v27 }
0x17cb   :  { %v1454_v35 = vadd.f32 -1.0, %v1217_v34 }
0x17cc   :  { %v1212_v37 = vpop.permute.xlu0 %1211 }
0x17cd   :  { %v1221_v38 = vmul.f32 0.5, %v1454_v35  ;;  %v1216_v39 = vadd.f32 %v1212_v37, %v1204_v36 }
0x17cf   :  { %v1218_v40 = vsub.f32 %v1216_v39, %v1180_v9  ;;  %1225 = vrot.lane.b32.xlu1 %v1221_v38, %s1737_s7 }
0x17d1   :  { %v1455_v41 = vadd.f32 -1.0, %v1218_v40 }
0x17d3   :  { %v1222_v10 = vmul.f32 0.5, %v1455_v41  ;;  %1324 = vrot.lane.b32.xlu1 %v1993_v7, %s1740_s16 }
0x17d5   :  { %1227 = vrot.lane.b32.xlu0 %v1222_v10, %s1737_s7 }
0x1841   :  { %v1226_v46 = vpop.permute.xlu1 %1225 }
0x1842   :  { %v1232_v47 = vsel %vm1231_vm8, %v1226_v46, 0.0 }
0x1843   :  { %1233 = vadd.xlane.f32.xlu0 %v1232_v47 }
0x1845   :  { %v1325_v4 = vpop.permute.xlu1 %1324 }
0x1847   :  { %v1228_v29 = vpop.permute.xlu0 %1227 }
0x1848   :  { %v1235_v48 = vsel %vm1231_vm8, %v1228_v29, 0.0 }
0x1849   :  { %1236 = vadd.xlane.f32.xlu1 %v1235_v48 }
0x188a   :  { %v1643_v49 = vpop.f32.mrf.mxu1 }
0x188b   :  { %v1319_v50 = vadd.f32 %v1643_v49, %v1239_v33 }
0x188c   :  { %v1313_v8 = vpop.f32.mrf.mxu1 }
0x188d   :  { %v1314_v51 = vadd.f32 %v1313_v8, %v1239_v33  ;;  %v1323_v53 = vmax.f32 %v1319_v50, 0.0 }
0x188f   :  { %v1322_v52 = vmax.f32 %v1314_v51, 0.0 }
0x1891   :  { %1652 = vmatprep.mubr.msk.f32.mxu0 %vm118_vm4, %v1322_v52 }
0x1892   :  { %1653 = vmatmul.mubr.msk.f32.vlgmr.msra.gmra.mxu0 %vm118_vm4, %v1323_v53 }
0x18cc   :  { %v1234_v6 = vpop.xlane.xlu0 %1233 }
0x18d2   :  { %v1237_v57 = vpop.xlane.xlu1 %1236 }
0x1952   :  { %v1654_v54 = vpop.f32.mrf.mxu0 }
0x1953   :  { %v1405_v55 = vadd.f32 %v1654_v54, %v1325_v4 }
0x1954   :  { %v1399_v5 = vpop.f32.mrf.mxu0 }
0x1955   :  { %v1400_v56 = vadd.f32 %v1399_v5, %v1325_v4  ;;  %1416 = vrot.lane.b32.xlu1 %v1405_v55, %s1738_s8 }
0x1957   :  { %1414 = vrot.lane.b32.xlu0 %v1400_v56, %s1738_s8 }
0x19c7   :  { %v1417_v58 = vpop.permute.xlu1 %1416 }
0x19c8   :  { %1422 = vst.msk [vmem:[%s2069_s5 + $0x8] sm:$0xff] %vm1420_vm9, %v1417_v58 }
0x19c9   :  { %1425 = vst.msk [vmem:[%s2069_s5 + $0x8] sm:$0xff] %vm1423_vm10, %v1237_v57  ;;  %v1415_v7 = vpop.permute.xlu0 %1414 }
0x19ca   :  { %1421 = vst.msk [vmem:[%s2069_s5] sm:$0xff] %vm1420_vm9, %v1415_v7 }
0x19cb   :  { %1424 = vst.msk [vmem:[%s2069_s5] sm:$0xff] %vm1423_vm10, %v1234_v6 }

</bundles_post_ra>
